<compile_context>
chip_gen: v7x
topology: tpu7x:2x2x1
jax: 0.10.0
libtpu: 0.0.40
codegen_flags: <defaults>
</compile_context>

<pallas_src>
import math

import jax
import jax.numpy as jnp
from jax.experimental import pallas as pl
from jax.experimental.pallas import tpu as pltpu

_LANES = 128
_SUBLANES = 8
_TARGET_TM = 8192                       # rows-per-block target (HBM-bandwidth bound)
_VMEM_BUFFER_BUDGET = 20 * 1024 * 1024  # cap on double-buffered in+out blocks
_VMEM_LIMIT_CAP = 48 * 1024 * 1024      # never request more scoped VMEM than this


def _attention_kernel_plain(x_ref, w_ref, b_ref, o_ref):
    # x_ref: (tm, D)   w_ref: (1, D) f32   b_ref: (1,) f32 in SMEM   o_ref: (tm, D)
    xf = x_ref[...].astype(jnp.float32)
    score = jnp.sum(xf * w_ref[...], axis=-1, keepdims=True) + b_ref[0]   # f32 accum
    o_ref[...] = (xf * score).astype(o_ref.dtype)


def _attention_kernel_folded(x_ref, seg_ref, b_ref, o_ref):
    # Lane-dense path: k = 128 // D original rows folded into the 128-wide lane axis.
    # x_ref: (tm, 128); seg_ref: (128, 128) block-diagonal with the Linear weight
    # folded in (seg[p, q] = w[p % D] iff p, q lie in the same D-block), so a single
    # f32-accumulated MXU matmul performs weight multiply + segmented lane reduce +
    # lane broadcast of the per-row score.
    # TODO(synk): on v7x, if a bundle dump shows the f32 matmul binding above the
    # per-tile DMA, switch to a bf16x2-split matmul with f32 accumulation.
    xf = x_ref[...].astype(jnp.float32)
    score = jnp.dot(xf, seg_ref[...], preferred_element_type=jnp.float32) + b_ref[0]
    o_ref[...] = (xf * score).astype(o_ref.dtype)


def attention_forward(x, weight, bias):
    """Forward of Attention: x * (x @ W.T + b).  x: (..., D); weight: (1, D); bias: (1,)."""
    orig_shape = x.shape
    D = orig_shape[-1]
    M = int(math.prod(orig_shape[:-1]))
    dtype = x.dtype
    itemsize = jnp.dtype(dtype).itemsize

    # Lane folding: pack k = 128 // D rows into a 128-wide lane axis when possible.
    # This is a contiguous reshape -> metadata only, no extra HBM traffic.
    if D < _LANES and _LANES % D == 0 and M % (_LANES // D) == 0:
        k = _LANES // D
    else:
        k = 1
        # TODO(synk): generalize folding to lcm(D, 128) lanes (e.g. D = 96) and split
        # off the < k-row tail instead of dropping the whole call to the lane-sparse path.
    kd = k * D
    m_rows = M // k
    x_fold = x.reshape(m_rows, kd)          # contiguous merge of dims -> free

    # --- Row-tile selection ---------------------------------------------------
    # Sub-32-bit dtypes pack rows along sublanes -> dtype-aware rounding.
    sub_mult = _SUBLANES * max(1, 4 // max(1, itemsize))
    row_bytes = kd * itemsize
    # Largest tile whose double-buffered in+out blocks stay under budget.
    max_tm_budget = max(sub_mult,
                        (_VMEM_BUFFER_BUDGET // (4 * row_bytes)) // sub_mult * sub_mult)
    tm = min(_TARGET_TM, max_tm_budget)
    # Keep >= 2 grid steps when there is enough work so the "parallel" grid axis can
    # shard across both TensorCores on v7x (1-TC chips are unaffected).
    if m_rows >= 2 * sub_mult:
        half = pl.cdiv(pl.cdiv(m_rows, 2), sub_mult) * sub_mult
        tm = min(tm, half)
    m_rounded = pl.cdiv(m_rows, sub_mult) * sub_mult
    tm = max(sub_mult, min(tm, m_rounded))
    tm = (tm // sub_mult) * sub_mult
    grid_m = pl.cdiv(m_rows, tm)            # ragged last block is masked by Pallas

    b1 = bias.reshape(1).astype(jnp.float32)
    x_spec = pl.BlockSpec((tm, kd), lambda i: (i, 0))
    o_spec = pl.BlockSpec((tm, kd), lambda i: (i, 0))
    b_spec = pl.BlockSpec(memory_space=pltpu.MemorySpace.SMEM)

    if k > 1:
        # Block-diagonal segmented-reduce matrix with the Linear weight folded in.
        w_block = jnp.broadcast_to(weight.reshape(D, 1).astype(jnp.float32), (D, D))
        seg_w = jnp.kron(jnp.eye(k, dtype=jnp.float32), w_block)        # (128, 128)
        kernel = _attention_kernel_folded
        in_specs = [x_spec, pl.BlockSpec((kd, kd), lambda i: (0, 0)), b_spec]
        args = (x_fold, seg_w, b1)
        const_bytes = 2 * kd * kd * 4
        flops = 2 * m_rows * kd * kd + 2 * M * D
    else:
        w2d = weight.reshape(1, D).astype(jnp.float32)
        kernel = _attention_kernel_plain
        in_specs = [x_spec, pl.BlockSpec((1, kd), lambda i: (0, 0)), b_spec]
        args = (x_fold, w2d, b1)
        const_bytes = 2 * _SUBLANES * max(kd, _LANES) * 4
        flops = 3 * M * D

    # Scoped VMEM: actual double-buffered I/O blocks + in-kernel f32 intermediates
    # + resident constants + headroom.  Stays well under v7x's 64 MiB physical.
    io_bytes = 4 * tm * kd * itemsize
    temp_bytes = 2 * tm * kd * 4
    vmem_limit = min(max(io_bytes + temp_bytes + const_bytes + (4 << 20), 8 << 20),
                     _VMEM_LIMIT_CAP)

    cost = pl.CostEstimate(flops=flops, transcendentals=0,
                           bytes_accessed=2 * M * D * itemsize + const_bytes // 2)

    out_fold = pl.pallas_call(
        kernel,
        out_shape=jax.ShapeDtypeStruct((m_rows, kd), dtype),
        grid_spec=pl.GridSpec(grid=(grid_m,), in_specs=in_specs, out_specs=o_spec),
        compiler_params=pltpu.CompilerParams(
            dimension_semantics=("parallel",),
            vmem_limit_bytes=vmem_limit,
        ),
        cost_estimate=cost,
    )(*args)

    return out_fold.reshape(orig_shape)     # metadata-only reshape back


def attention_reference(x, weight, bias):
    # Pure-JAX reference mirroring nn.Linear(dim, 1): x @ W.T + b, then x * weight
    w = jnp.einsum("...d,od->...o", x, weight) + bias   # (..., 1)
    return x * w


if __name__ == "__main__":
    key = jax.random.PRNGKey(0)
    kx, kw, kb, kx2, kx3, kw3, kx4 = jax.random.split(key, 7)

    # 1) Primary small test: B=2, S=8, D=32 (lane-folded path, k = 128 // 32 = 4).
    B, S, D = 2, 8, 32
    x = jax.random.normal(kx, (B, S, D), dtype=jnp.float32)
    weight = jax.random.normal(kw, (1, D), dtype=jnp.float32) * 0.1
    bias = jax.random.normal(kb, (1,), dtype=jnp.float32) * 0.1

    out = jax.block_until_ready(attention_forward(x, weight, bias))
    ref = attention_reference(x, weight, bias)
    assert out.shape == (B, S, D)
    assert jnp.allclose(out, ref, atol=1e-4, rtol=1e-4), "mismatch (folded, small)"

    # 2) Multi-block folded path with a ragged last block (M=500, m_rows=125, grid=2).
    x_big = jax.random.normal(kx4, (5, 100, D), dtype=jnp.float32)
    out_big = jax.block_until_ready(attention_forward(x_big, weight, bias))
    ref_big = attention_reference(x_big, weight, bias)
    assert jnp.allclose(out_big, ref_big, atol=1e-4, rtol=1e-4), "mismatch (folded, ragged)"

    # 3) M % k != 0 (M=15): falls back to the plain per-row kernel, ragged last block.
    x_odd = jax.random.normal(kx2, (3, 5, D), dtype=jnp.float32)
    out_odd = jax.block_until_ready(attention_forward(x_odd, weight, bias))
    ref_odd = attention_reference(x_odd, weight, bias)
    assert jnp.allclose(out_odd, ref_odd, atol=1e-4, rtol=1e-4), "mismatch (plain fallback)"

    # 4) Wide-D path (no lane folding): D = 256.
    D2 = 256
    x_wide = jax.random.normal(kx3, (2, 8, D2), dtype=jnp.float32)
    w_wide = jax.random.normal(kw3, (1, D2), dtype=jnp.float32) * 0.1
    out_wide = jax.block_until_ready(attention_forward(x_wide, w_wide, bias))
    ref_wide = attention_reference(x_wide, w_wide, bias)
    assert jnp.allclose(out_wide, ref_wide, atol=1e-4, rtol=1e-4), "mismatch (wide)"

    print("KERNEL_OK")
</pallas_src>

<mosaic_0001>
module attributes {stable_mosaic.version = 11 : i64} {
  func.func @_attention_kernel_folded(%arg0: i32, %arg1: memref<8x128xf32, #tpu.memory_space<vmem>>, %arg2: memref<128x128xf32, #tpu.memory_space<vmem>>, %arg3: memref<1xf32, #tpu.memory_space<smem>>, %arg4: memref<8x128xf32, #tpu.memory_space<vmem>>) attributes {dimension_semantics = [#tpu.dimension_semantics<parallel>], iteration_bounds = array<i64: 1>, scalar_prefetch = 0 : i64, scratch_operands = 0 : i64, tpu.core_type = #tpu.core_type<tc>, window_params = [{transform_indices = @transform_0, window_bounds = array<i64: 8, 128>}, {pipeline_mode = #tpu.pipeline_mode<synchronous>, transform_indices = @transform_1, window_bounds = array<i64: 128, 128>}, {transform_indices = @transform_2, window_bounds = array<i64: 1>}, {transform_indices = @transform_3, window_bounds = array<i64: 8, 128>}]} {
    %c0 = arith.constant 0 : index
    %c0_0 = arith.constant 0 : index
    %0 = vector.load %arg1[%c0, %c0_0] : memref<8x128xf32, #tpu.memory_space<vmem>>, vector<8x128xf32>
    %c0_1 = arith.constant 0 : index
    %c0_2 = arith.constant 0 : index
    %1 = vector.load %arg2[%c0_1, %c0_2] : memref<128x128xf32, #tpu.memory_space<vmem>>, vector<128x128xf32>
    %cst = arith.constant dense<0.000000e+00> : vector<8x128xf32>
    %2 = tpu.matmul %0, %1, %cst {dimension_numbers = #tpu.dot_dimension_numbers<[1], [0], [0], [1], [0, 0, 1, 1], [], []>} : vector<8x128xf32>, vector<128x128xf32>, vector<8x128xf32> -> vector<8x128xf32>
    %c0_3 = arith.constant 0 : index
    %3 = memref.load %arg3[%c0_3] : memref<1xf32, #tpu.memory_space<smem>>
    %4 = vector.broadcast %3 : f32 to vector<8x128xf32>
    %5 = arith.addf %2, %4 : vector<8x128xf32>
    %6 = arith.mulf %0, %5 : vector<8x128xf32>
    %c0_4 = arith.constant 0 : index
    %c0_5 = arith.constant 0 : index
    %7 = vector.load %arg4[%c0_4, %c0_5] : memref<8x128xf32, #tpu.memory_space<vmem>>, vector<8x128xf32>
    tpu.vector_store %arg4[%c0_4, %c0_5], %6 {strides = array<i32>} : memref<8x128xf32, #tpu.memory_space<vmem>>, vector<8x128xf32>,
    return
  }
  func.func @transform_0(%arg0: i32) -> (i32, i32) {
    %c0_i32 = arith.constant 0 : i32
    %c0_i32_0 = arith.constant 0 : i32
    return %arg0, %c0_i32 : i32, i32
  }
  func.func @transform_1(%arg0: i32) -> (i32, i32) {
    %c0_i32 = arith.constant 0 : i32
    %c0_i32_0 = arith.constant 0 : i32
    %c0_i32_1 = arith.constant 0 : i32
    return %c0_i32, %c0_i32_0 : i32, i32
  }
  func.func @transform_2(%arg0: i32) -> i32 {
    %c0_i32 = arith.constant 0 : i32
    %c0_i32_0 = arith.constant 0 : i32
    return %c0_i32 : i32
  }
  func.func @transform_3(%arg0: i32) -> (i32, i32) {
    %c0_i32 = arith.constant 0 : i32
    %c0_i32_0 = arith.constant 0 : i32
    return %arg0, %c0_i32 : i32, i32
  }
}

</mosaic_0001>

<bundles_post_ra>
// kernel: tpu_custom_call.1
= control target key start
LH: loop header
LB: loop body
LE: loop exit
PB: predicated region body
PF: predicated region fallthrough
CT: control target
= control target key end

     0   :  { %9 = vsyncpa [#allocation4], 0  ;;  %s386_s0 = inlined_call_operand.hbm [shape: f32[4,128], index: 0, kind: input, shape index: {}]   ;;  %s387_s1 = inlined_call_operand.hbm [shape: f32[128,128], index: 1, kind: input, shape index: {}]   ;;  %s388_s2 = inlined_call_operand.<no memory space> [shape: f32[1], index: 2, kind: input, shape index: {}]   ;;  %s389_s3 = inlined_call_operand.hbm [shape: f32[4,128], index: 3, kind: output, shape index: {}]  }
   0x1   :  { %10 = vsyncpa [#allocation7], 0 }
   0x2   :  { %11 = vsyncpa [#allocation5], 0 }
   0x3   :  { %16 = vsyncadd [#allocation4], 64  ;;  %s311_s12 = smov [#allocation3]   ;;  %s239_s16 = scalar_lea.hbm %s386_s0, 64 }
   0x4   :  { %s17_s13 = sshll.u32 %s311_s12, 4  ;;  %p240_p0 = scmp.ne.s32.totalorder %s386_s0, %s239_s16  ;;  %s18_s13 = int_to_ptr.vmem [resolvable:$true] %s17_s13 }
   0x5   :  { %p243_p1 = scmp.lt.u32.totalorder %s239_s16, %s386_s0 }
   0x7   :  { %p245_p2 = pnand %p243_p1, %p240_p0 }
   0x9   :  { %248 = shalt.err (!%p245_p2)
}
   0xa   :  { %s249_s21 = scalar_lea.vmem %s18_s13, 64  ;;  %s253_s22 = scalar_lea.vmem %s18_s13, 128 }
   0xb   :  { %p250_p3 = scmp.ne.s32.totalorder %s18_s13, %s249_s21  ;;  %p254_p4 = scmp.lt.s32.totalorder %s18_s13, %s18_s13 }
   0xc   :  { %p255_p5 = scmp.lt.s32.totalorder %s253_s22, %s249_s21 }
   0xe   :  { %p256_p6 = por %p255_p5, %p254_p4 }
  0x10   :  { %p257_p7 = pnand %p256_p6, %p250_p3 }
  0x12   :  { %260 = shalt.err (!%p257_p7)
}
  0x13   :  { %s312_s23 = smov 64   ;;  %s313_s24 = smov 4  }
  0x14   :  { %23 = dma.hbm_to_vmem [thread:$0]  %s386_s0, 64, %s18_s13, [#allocation4], %s312_s23, %s312_s23, %s313_s24  }
  0x15   :  { %s314_s27 = smov [#allocation6]   ;;  %s261_s4 = scalar_lea.hbm %s387_s1, 2048 }
  0x16   :  { %s29_s28 = sshll.u32 %s314_s27, 4  ;;  %p262_p8 = scmp.ne.s32.totalorder %s387_s1, %s261_s4  ;;  %s30_s28 = int_to_ptr.vmem [resolvable:$true] %s29_s28 }
  0x17   :  { %p265_p9 = scmp.lt.u32.totalorder %s261_s4, %s387_s1 }
  0x19   :  { %p267_p10 = pnand %p265_p9, %p262_p8 }
  0x1b   :  { %270 = shalt.err (!%p267_p10)
}
  0x1c   :  { %s271_s9 = scalar_lea.vmem %s30_s28, 2048  ;;  %p276_p12 = scmp.lt.s32.totalorder %s30_s28, %s30_s28 }
  0x1d   :  { %p272_p11 = scmp.ne.s32.totalorder %s30_s28, %s271_s9  ;;  %p277_p13 = scmp.lt.s32.totalorder %s271_s9, %s271_s9 }
  0x1f   :  { %p278_p0 = por %p277_p13, %p276_p12 }
  0x21   :  { %p279_p1 = pnand %p278_p0, %p272_p11 }
  0x23   :  { %282 = shalt.err (!%p279_p1)
}
  0x24   :  { %s315_s0 = smov 128   ;;  %s316_s10 = smov 8  }
  0x25   :  { %35 = dma.hbm_to_vmem [thread:$0]  %s387_s1, 2048, %s30_s28, [#allocation7], %s315_s0, %s315_s0, %s316_s10  }
  0x26   :  { %305 = dma.done.wait [#allocation4], 128  }
  0x27   :  { %306 = vsyncadd [#allocation4], 4294967168 }
  0x28   :  { %307 = dma.done.wait [#allocation7], 2048  }
  0x29   :  { %308 = vsyncadd [#allocation7], 4294965248  ;;  %v317_v0 = vmov 0.0|0.0   ;;  %vm318_vm0 = vmmov 0   ;;  %v319_v1 = vmov 0.0   ;;  %v45_v2 = vld [vmem:[#allocation6] sm:$0xff]  ;;  %v62_v27 = vstv %s388_s2 }
  0x2a   :  { %205 = vmatprep.subr.bf16.mxu0 %v317_v0  ;;  %202 = vmatprep.mubr.msk.f32.mxu0 %vm318_vm0, %v319_v1  ;;  %v46_v3 = vld [vmem:[#allocation6 + $0x8] sm:$0xff]  ;;  %v47_v4 = vld [vmem:[#allocation6 + $0x10] sm:$0xff]  ;;  %v48_v6 = vld [vmem:[#allocation6 + $0x18] sm:$0xff] }
  0x2b   :  { %v206_v5 = vpack.c.bf16 %v46_v3, %v45_v2  ;;  %v209_v7 = vpack.c.bf16 %v48_v6, %v47_v4  ;;  %v49_v8 = vld [vmem:[#allocation6 + $0x20] sm:$0xff]  ;;  %v50_v9 = vld [vmem:[#allocation6 + $0x28] sm:$0xff]  ;;  %v51_v11 = vld [vmem:[#allocation6 + $0x30] sm:$0xff] }
  0x2c   :  { %v212_v10 = vpack.c.bf16 %v50_v9, %v49_v8  ;;  %v52_v12 = vld [vmem:[#allocation6 + $0x38] sm:$0xff]  ;;  %v53_v14 = vld [vmem:[#allocation6 + $0x40] sm:$0xff]  ;;  %v54_v15 = vld [vmem:[#allocation6 + $0x48] sm:$0xff] }
  0x2d   :  { %207 = vmatpush3.bf16.msra.mxu0 %v206_v5  ;;  %v215_v13 = vpack.c.bf16 %v52_v12, %v51_v11  ;;  %v218_v16 = vpack.c.bf16 %v54_v15, %v53_v14  ;;  %v55_v17 = vld [vmem:[#allocation6 + $0x50] sm:$0xff]  ;;  %v56_v18 = vld [vmem:[#allocation6 + $0x58] sm:$0xff]  ;;  %v57_v20 = vld [vmem:[#allocation6 + $0x60] sm:$0xff] }
  0x2e   :  { %208 = vmatprep.subr.bf16.mxu0 %v317_v0  ;;  %v221_v19 = vpack.c.bf16 %v56_v18, %v55_v17  ;;  %v58_v21 = vld [vmem:[#allocation6 + $0x68] sm:$0xff]  ;;  %v59_v23 = vld [vmem:[#allocation6 + $0x70] sm:$0xff]  ;;  %v60_v24 = vld [vmem:[#allocation6 + $0x78] sm:$0xff] }
  0x2f   :  { %v224_v22 = vpack.c.bf16 %v58_v21, %v57_v20  ;;  %v227_v25 = vpack.c.bf16 %v60_v24, %v59_v23  ;;  %v44_v26 = vld [vmem:[#allocation3] sm:$0xff] }
  0x31   :  { %210 = vmatpush3.bf16.msra.mxu0 %v209_v7 }
  0x32   :  { %211 = vmatprep.subr.bf16.mxu0 %v317_v0 }
  0x35   :  { %213 = vmatpush3.bf16.msra.mxu0 %v212_v10 }
  0x36   :  { %214 = vmatprep.subr.bf16.mxu0 %v317_v0 }
  0x39   :  { %216 = vmatpush3.bf16.msra.mxu0 %v215_v13 }
  0x3a   :  { %217 = vmatprep.subr.bf16.mxu0 %v317_v0 }
  0x3d   :  { %219 = vmatpush3.bf16.msra.mxu0 %v218_v16 }
  0x3e   :  { %220 = vmatprep.subr.bf16.mxu0 %v317_v0 }
  0x41   :  { %222 = vmatpush3.bf16.msra.mxu0 %v221_v19 }
  0x42   :  { %223 = vmatprep.subr.bf16.mxu0 %v317_v0 }
  0x45   :  { %225 = vmatpush3.bf16.msra.mxu0 %v224_v22 }
  0x46   :  { %226 = vmatprep.subr.bf16.mxu0 %v317_v0 }
  0x49   :  { %228 = vmatpush3.bf16.msra.mxu0 %v227_v25 }
  0x4c   :  { %203 = vmatmul.mubr.f32.vlgmr.msra.gmra.mrb[0].mxu0 %v44_v26 }
 0x11f   :  { %v129_v28 = vpop.f32.mrb[0].mxu0 }
 0x120   :  { %v130_v29 = vadd.f32 %v129_v28, %v62_v27  ;;  %v204_v30 = vpop.f32.mrb[1].mxu0 }
 0x122   :  { %v133_v31 = vmul.f32 %v130_v29, %v44_v26 }
 0x124   :  { %134 = vst [vmem:[#allocation8] sm:$0xff] %v133_v31 }
 0x125   :  { %139 = vsyncadd [#allocation5], 64  ;;  %s320_s14 = smov [#allocation8]  }
 0x126   :  { %s140_s15 = sshll.u32 %s320_s14, 4  ;;  %s141_s15 = int_to_ptr.vmem [resolvable:$true] %s140_s15 }
 0x127   :  { %s283_s16 = scalar_lea.vmem %s141_s15, 64  ;;  %s287_s17 = scalar_lea.vmem %s141_s15, 128 }
 0x128   :  { %p284_p2 = scmp.ne.s32.totalorder %s141_s15, %s283_s16  ;;  %p288_p3 = scmp.lt.s32.totalorder %s141_s15, %s141_s15 }
 0x129   :  { %p289_p4 = scmp.lt.s32.totalorder %s287_s17, %s283_s16 }
 0x12b   :  { %p290_p5 = por %p289_p4, %p288_p3 }
 0x12d   :  { %p291_p6 = pnand %p290_p5, %p284_p2 }
 0x12f   :  { %294 = shalt.err (!%p291_p6)
}
 0x130   :  { %s295_s2 = scalar_lea.hbm %s389_s3, 64 }
 0x131   :  { %p296_p7 = scmp.ne.s32.totalorder %s389_s3, %s295_s2  ;;  %p299_p8 = scmp.lt.u32.totalorder %s295_s2, %s389_s3 }
 0x133   :  { %p301_p9 = pnand %p299_p8, %p296_p7 }
 0x135   :  { %304 = shalt.err (!%p301_p9)
}
 0x136   :  { %146 = dma.vmem_to_hbm [thread:$0]  %s141_s15, 64, %s389_s3, [#allocation5], %s312_s23, %s312_s23, %s313_s24  }
 0x137   :  { %309 = dma.done.wait [#allocation5], 128  }
 0x138   :  { %310 = vsyncadd [#allocation5], 4294967168 }
 0x139   :  { %150 = vsyncpa [#allocation4], 1 }
 0x13a   :  { %151 = vsyncpa [#allocation7], 1 }
 0x13b   :  { %152 = vsyncpa [#allocation5], 1 }

</bundles_post_ra>
